<compile_context>
chip_gen: v6e
topology: v6e:2x2x1
jax: 0.10.0
libtpu: 0.0.40
codegen_flags: <defaults>
</compile_context>

<pallas_src>
import functools

import jax
import jax.numpy as jnp
from jax.experimental import pallas as pl
from jax.experimental.pallas import tpu as pltpu


# ---------------------------------------------------------------------------
# Kernel: one LEConv aggregation layer,  out = [relu]( S @ A + D )
# ---------------------------------------------------------------------------
def _leconv_spmm_kernel(s_ref, a_ref, d_ref, o_ref, acc_ref, *, apply_relu):
    k = pl.program_id(1)                       # contraction tile (reduction, last axis)

    @pl.when(k == 0)
    def _init():
        acc_ref[...] = jnp.zeros_like(acc_ref)

    # Dominant work: bf16 S tile @ bf16 A tile, f32 accumulate on the MXU.
    acc_ref[...] += jnp.dot(s_ref[...], a_ref[...],
                            preferred_element_type=jnp.float32)

    @pl.when(k == pl.num_programs(1) - 1)
    def _finalize():
        h = acc_ref[...] + d_ref[...]          # D = lin3(x) - deg * lin2(x) (hoisted)
        if apply_relu:
            h = jnp.maximum(h, 0.0)
        o_ref[...] = h.astype(o_ref.dtype)


def _leconv_aggregate(s, a, d, *, npad, tm, tk, hidden, apply_relu, vmem_limit):
    grid = (npad // tm, npad // tk)
    kern = functools.partial(_leconv_spmm_kernel, apply_relu=apply_relu)

    cost = pl.CostEstimate(
        flops=int(2 * npad * npad * hidden),
        transcendentals=0,
        bytes_accessed=int(2 * npad * npad            # bf16 S read once
                           + (2 + 4 + 4) * npad * hidden),   # A (bf16), D, out (f32)
    )

    return pl.pallas_call(
        kern,
        out_shape=jax.ShapeDtypeStruct((npad, hidden), jnp.float32),
        grid_spec=pltpu.PrefetchScalarGridSpec(
            num_scalar_prefetch=0,
            grid=grid,
            in_specs=[
                pl.BlockSpec((tm, tk), lambda i, k: (i, k)),       # S tiles (bf16 stream)
                pl.BlockSpec((tk, hidden), lambda i, k: (k, 0)),   # A = lin1(x)   (bf16)
                pl.BlockSpec((tm, hidden), lambda i, k: (i, 0)),   # D (per-row, f32)
            ],
            out_specs=pl.BlockSpec((tm, hidden), lambda i, k: (i, 0)),
            scratch_shapes=[pltpu.VMEM((tm, hidden), jnp.float32)],   # f32 accumulator
        ),
        compiler_params=pltpu.CompilerParams(
            dimension_semantics=("parallel", "arbitrary"),   # rows parallel (v7x 2 TC)
            vmem_limit_bytes=vmem_limit,
        ),
        cost_estimate=cost,
    )(s, a, d)


# ---------------------------------------------------------------------------
# Per-generation tiling plan.
# ---------------------------------------------------------------------------
def _round_up(n, m):
    return int(((n + m - 1) // m) * m)


def _vmem_limit_bytes():
    try:
        info = pltpu.get_tpu_info()
        phys = int(info.vmem_capacity_bytes)
    except Exception:
        phys = 64 * 1024 * 1024            # conservative default (v7x per-core VMEM)
    return int(phys * 3 // 4)              # ~96 MiB on v5e/v6e, ~48 MiB on v7x


def _tile_plan(n, vmem_limit):
    """Returns (npad, tm, tk); npad is a multiple of both tm and tk and every
    block satisfies the (8, 128) rule (either divisible or full-extent)."""
    npad8 = _round_up(max(n, 8), 8)
    # Full-block, VMEM-resident S: one big tile per layer call (budget assumes the
    # pipeline may still hold two buffers of that block).
    if 2 * 2 * npad8 * npad8 <= int(0.45 * vmem_limit):
        return npad8, npad8, npad8
    # Streamed tiles: 512 rows on the "parallel" axis; pick tk so the zero-padding
    # waste on the O(N^2) S stream stays bounded (tk multiple of tm => lcm == tk).
    tm = 512
    for tk in (2048, 1024, 512):
        npad = _round_up(n, tk)
        if npad - n <= max(n // 16, tk // 4):
            return npad, tm, tk
    return _round_up(n, 512), tm, 512


# ---------------------------------------------------------------------------
# Full model forward (per-node projections + graph glue stay in plain JAX).
# ---------------------------------------------------------------------------
def leconv_gnn_edge_classifier(params, x, edge_index, w, *, tile_plan=None):
    n = x.shape[0]
    hidden = params["w1"].shape[-1]
    row, col = edge_index[0], edge_index[1]

    vmem_limit = _vmem_limit_bytes()
    npad, tm, tk = tile_plan if tile_plan is not None else _tile_plan(n, vmem_limit)

    # Weighted dense adjacency, aggregation at target nodes (edge_index[1]):
    # S[i, j] = sum of w over edges j -> i.  Scatter directly into the padded
    # buffer + single cast (bf16 halves the dominant HBM stream; keep f32 here
    # if tighter accuracy is needed).
    s = (jnp.zeros((npad, npad), jnp.float32)
         .at[col, row].add(w)
         .astype(jnp.bfloat16))
    # Weighted in-degree via an O(E) segment-sum (no O(N^2) row reduction).
    deg = jnp.zeros((n,), jnp.float32).at[col].add(w)[:, None]

    def node_projections(h, wk, bk):
        # Hoisted out of the Pallas hot loop (tiny O(N*H*C) matmuls):
        #   A = lin1(h),    D = lin3(h) - deg * lin2(h)       (lin2 has no bias)
        a = h @ wk[0] + bk[0]
        d = (h @ wk[2] + bk[1]) - deg * (h @ wk[1])
        return a, d

    def pad_rows(m):
        return jnp.pad(m, ((0, npad - n), (0, 0)))

    x32 = x.astype(jnp.float32)

    # ---- conv1 + ReLU -------------------------------------------------------
    a1, d1 = node_projections(x32, params["w1"], params["b1"])
    h1 = _leconv_aggregate(
        s, pad_rows(a1).astype(jnp.bfloat16), pad_rows(d1),
        npad=npad, tm=tm, tk=tk, hidden=hidden,
        apply_relu=True, vmem_limit=vmem_limit)[:n]

    # ---- conv2 --------------------------------------------------------------
    a2, d2 = node_projections(h1, params["w2"], params["b2"])
    h2 = _leconv_aggregate(
        s, pad_rows(a2).astype(jnp.bfloat16), pad_rows(d2),
        npad=npad, tm=tm, tk=tk, hidden=hidden,
        apply_relu=False, vmem_limit=vmem_limit)[:n]

    # ---- edge classifier:  cat([h2[row], h2[col]]) @ Wc + bc == P[row] + Q[col]
    p = h2 @ params["wc"][0] + params["bc"][0]
    q = h2 @ params["wc"][1]
    return jnp.take(p, row, axis=0) + jnp.take(q, col, axis=0)


# ---------------------------------------------------------------------------
# Pure-JAX reference (mirrors torch_geometric LEConv + nn.Linear exactly).
# ---------------------------------------------------------------------------
def leconv_reference(params, x, edge_index, w):
    row, col = edge_index[0], edge_index[1]

    def layer(h, wk, bk):
        a = h @ wk[0] + bk[0]           # lin1 (bias)
        b = h @ wk[1]                   # lin2 (no bias)
        c = h @ wk[2] + bk[1]           # lin3 (bias)
        msg = w[:, None] * (a[row] - b[col])
        agg = jnp.zeros((h.shape[0], wk.shape[-1]), jnp.float32).at[col].add(msg)
        return agg + c

    h = jax.nn.relu(layer(x, params["w1"], params["b1"]))
    h = layer(h, params["w2"], params["b2"])
    emb = jnp.concatenate([h[row], h[col]], axis=-1)
    wc_full = jnp.concatenate([params["wc"][0], params["wc"][1]], axis=0)
    return emb @ wc_full + params["bc"][0]


# ---------------------------------------------------------------------------
if __name__ == "__main__":
    in_channels, hidden_channels, out_channels = 8, 16, 4

    def make_problem(key, n, e):
        ks = jax.random.split(key, 10)
        x = jax.random.normal(ks[0], (n, in_channels), jnp.float32)
        row = jax.random.randint(ks[1], (e,), 0, n)
        col = jax.random.randint(ks[2], (e,), 0, n)
        edge_index = jnp.stack([row, col], axis=0).astype(jnp.int32)
        w_edge = jax.random.uniform(ks[3], (e,), jnp.float32, 0.5, 1.5)
        # Stacked [lin1.W, lin2.W, lin3.W] per LEConv (already [C_in, C_out]),
        # biases stacked [lin1.b, lin3.b]; classifier weight split src/dst.
        params = {
            "w1": 0.1 * jax.random.normal(ks[4], (3, in_channels, hidden_channels), jnp.float32),
            "b1": 0.05 * jax.random.normal(ks[5], (2, hidden_channels), jnp.float32),
            "w2": 0.1 * jax.random.normal(ks[6], (3, hidden_channels, hidden_channels), jnp.float32),
            "b2": 0.05 * jax.random.normal(ks[7], (2, hidden_channels), jnp.float32),
            "wc": 0.1 * jax.random.normal(ks[8], (2, hidden_channels, out_channels), jnp.float32),
            "bc": 0.01 * jax.random.normal(ks[9], (1, out_channels), jnp.float32),
        }
        return params, x, edge_index, w_edge

    # --- Test 1: small graph -> full-block (VMEM-resident) S path ------------
    params, x, edge_index, w_edge = make_problem(jax.random.PRNGKey(0), 16, 32)
    out = jax.jit(leconv_gnn_edge_classifier)(params, x, edge_index, w_edge)
    jax.block_until_ready(out)
    ref = leconv_reference(params, x, edge_index, w_edge)
    assert out.shape == (32, out_channels)
    assert bool(jnp.all(jnp.isfinite(out)))
    assert bool(jnp.allclose(out, ref, atol=5e-2, rtol=5e-2)), (
        f"max abs diff {float(jnp.max(jnp.abs(out - ref)))}")

    # --- Test 2: force the streamed multi-tile path (3x3 grid, parallel rows) -
    params2, x2, edge_index2, w_edge2 = make_problem(jax.random.PRNGKey(1), 640, 2048)
    fwd2 = jax.jit(functools.partial(leconv_gnn_edge_classifier,
                                     tile_plan=(768, 256, 256)))
    out2 = fwd2(params2, x2, edge_index2, w_edge2)
    jax.block_until_ready(out2)
    ref2 = leconv_reference(params2, x2, edge_index2, w_edge2)
    assert out2.shape == (2048, out_channels)
    assert bool(jnp.all(jnp.isfinite(out2)))
    # bf16 S / A rounding accumulates through two aggregation layers -> looser tol.
    assert bool(jnp.allclose(out2, ref2, atol=1e-1, rtol=1e-1)), (
        f"max abs diff {float(jnp.max(jnp.abs(out2 - ref2)))}")

    print("KERNEL_OK")
</pallas_src>

<mosaic_0001>
module attributes {stable_mosaic.version = 11 : i64} {
  func.func private @main(%arg0: i32) attributes {dimension_semantics = [#tpu.dimension_semantics<core_parallel>], iteration_bounds = array<i64: 2>, tpu.core_type = #tpu.core_type<sc_scalar_subcore>, window_params = []} {
    return
  }
}

module attributes {stable_mosaic.version = 11 : i64} {
  func.func private @main(%arg0: i32) attributes {dimension_semantics = [#tpu.dimension_semantics<core_parallel>], iteration_bounds = array<i64: 2>, tpu.core_type = #tpu.core_type<sc_scalar_subcore>, window_params = []} {
    return
  }
}

module attributes {stable_mosaic.version = 11 : i64} {
  func.func @_leconv_spmm_kernel(%arg0: i32, %arg1: i32, %arg2: memref<16x16xbf16, #tpu.memory_space<vmem>>, %arg3: memref<16x16xbf16, #tpu.memory_space<vmem>>, %arg4: memref<16x16xf32, #tpu.memory_space<vmem>>, %arg5: memref<16x16xf32, #tpu.memory_space<vmem>>, %arg6: memref<16x16xf32, #tpu.memory_space<vmem>>) attributes {dimension_semantics = [#tpu.dimension_semantics<parallel>, #tpu.dimension_semantics<arbitrary>], iteration_bounds = array<i64: 1, 1>, scalar_prefetch = 0 : i64, scratch_operands = 1 : i64, tpu.core_type = #tpu.core_type<tc>, window_params = [{transform_indices = @transform_0, window_bounds = array<i64: 16, 16>}, {transform_indices = @transform_1, window_bounds = array<i64: 16, 16>}, {transform_indices = @transform_2, window_bounds = array<i64: 16, 16>}, {transform_indices = @transform_3, window_bounds = array<i64: 16, 16>}]} {
    %c0_i32 = arith.constant 0 : i32
    %0 = arith.cmpi eq, %arg1, %c0_i32 : i32
    %1 = arith.extui %0 : i1 to i32
    %c0_i32_0 = arith.constant 0 : i32
    %2 = arith.cmpi ne, %1, %c0_i32_0 : i32
    scf.if %2 {
      %cst_10 = arith.constant 0.000000e+00 : f32
      %12 = vector.broadcast %cst_10 : f32 to vector<16x16xf32>
      %c0_11 = arith.constant 0 : index
      %c0_12 = arith.constant 0 : index
      %13 = vector.load %arg6[%c0_11, %c0_12] : memref<16x16xf32, #tpu.memory_space<vmem>>, vector<16x16xf32>
      tpu.vector_store %arg6[%c0_11, %c0_12], %12 {strides = array<i32>} : memref<16x16xf32, #tpu.memory_space<vmem>>, vector<16x16xf32>,
    } else {
    }
    %c0 = arith.constant 0 : index
    %c0_1 = arith.constant 0 : index
    %3 = vector.load %arg6[%c0, %c0_1] : memref<16x16xf32, #tpu.memory_space<vmem>>, vector<16x16xf32>
    %c0_2 = arith.constant 0 : index
    %c0_3 = arith.constant 0 : index
    %4 = vector.load %arg2[%c0_2, %c0_3] : memref<16x16xbf16, #tpu.memory_space<vmem>>, vector<16x16xbf16>
    %c0_4 = arith.constant 0 : index
    %c0_5 = arith.constant 0 : index
    %5 = vector.load %arg3[%c0_4, %c0_5] : memref<16x16xbf16, #tpu.memory_space<vmem>>, vector<16x16xbf16>
    %cst = arith.constant dense<0.000000e+00> : vector<16x16xf32>
    %6 = tpu.matmul %4, %5, %cst {dimension_numbers = #tpu.dot_dimension_numbers<[1], [0], [0], [1], [0, 0, 1, 1], [], []>} : vector<16x16xbf16>, vector<16x16xbf16>, vector<16x16xf32> -> vector<16x16xf32>
    %7 = arith.addf %3, %6 : vector<16x16xf32>
    %c0_6 = arith.constant 0 : index
    %c0_7 = arith.constant 0 : index
    %8 = vector.load %arg6[%c0_6, %c0_7] : memref<16x16xf32, #tpu.memory_space<vmem>>, vector<16x16xf32>
    tpu.vector_store %arg6[%c0_6, %c0_7], %7 {strides = array<i32>} : memref<16x16xf32, #tpu.memory_space<vmem>>, vector<16x16xf32>,
    %c0_i32_8 = arith.constant 0 : i32
    %9 = arith.cmpi eq, %arg1, %c0_i32_8 : i32
    %10 = arith.extui %9 : i1 to i32
    %c0_i32_9 = arith.constant 0 : i32
    %11 = arith.cmpi ne, %10, %c0_i32_9 : i32
    scf.if %11 {
      %c0_10 = arith.constant 0 : index
      %c0_11 = arith.constant 0 : index
      %12 = vector.load %arg6[%c0_10, %c0_11] : memref<16x16xf32, #tpu.memory_space<vmem>>, vector<16x16xf32>
      %c0_12 = arith.constant 0 : index
      %c0_13 = arith.constant 0 : index
      %13 = vector.load %arg4[%c0_12, %c0_13] : memref<16x16xf32, #tpu.memory_space<vmem>>, vector<16x16xf32>
      %14 = arith.addf %12, %13 : vector<16x16xf32>
      %cst_14 = arith.constant 0.000000e+00 : f32
      %15 = vector.broadcast %cst_14 : f32 to vector<16x16xf32>
      %16 = arith.maximumf %14, %15 : vector<16x16xf32>
      %c0_15 = arith.constant 0 : index
      %c0_16 = arith.constant 0 : index
      %17 = vector.load %arg5[%c0_15, %c0_16] : memref<16x16xf32, #tpu.memory_space<vmem>>, vector<16x16xf32>
      tpu.vector_store %arg5[%c0_15, %c0_16], %16 {strides = array<i32>} : memref<16x16xf32, #tpu.memory_space<vmem>>, vector<16x16xf32>,
    } else {
    }
    return
  }
  func.func @transform_0(%arg0: i32, %arg1: i32) -> (i32, i32) {
    %c0_i32 = arith.constant 0 : i32
    return %arg0, %arg1 : i32, i32
  }
  func.func @transform_1(%arg0: i32, %arg1: i32) -> (i32, i32) {
    %c0_i32 = arith.constant 0 : i32
    %c0_i32_0 = arith.constant 0 : i32
    return %arg1, %c0_i32 : i32, i32
  }
  func.func @transform_2(%arg0: i32, %arg1: i32) -> (i32, i32) {
    %c0_i32 = arith.constant 0 : i32
    %c0_i32_0 = arith.constant 0 : i32
    return %arg0, %c0_i32 : i32, i32
  }
  func.func @transform_3(%arg0: i32, %arg1: i32) -> (i32, i32) {
    %c0_i32 = arith.constant 0 : i32
    %c0_i32_0 = arith.constant 0 : i32
    return %arg0, %c0_i32 : i32, i32
  }
}

module attributes {stable_mosaic.version = 11 : i64} {
  func.func @_leconv_spmm_kernel(%arg0: i32, %arg1: i32, %arg2: memref<16x16xbf16, #tpu.memory_space<vmem>>, %arg3: memref<16x16xbf16, #tpu.memory_space<vmem>>, %arg4: memref<16x16xf32, #tpu.memory_space<vmem>>, %arg5: memref<16x16xf32, #tpu.memory_space<vmem>>, %arg6: memref<16x16xf32, #tpu.memory_space<vmem>>) attributes {dimension_semantics = [#tpu.dimension_semantics<parallel>, #tpu.dimension_semantics<arbitrary>], iteration_bounds = array<i64: 1, 1>, scalar_prefetch = 0 : i64, scratch_operands = 1 : i64, tpu.core_type = #tpu.core_type<tc>, window_params = [{transform_indices = @transform_0, window_bounds = array<i64: 16, 16>}, {transform_indices = @transform_1, window_bounds = array<i64: 16, 16>}, {transform_indices = @transform_2, window_bounds = array<i64: 16, 16>}, {transform_indices = @transform_3, window_bounds = array<i64: 16, 16>}]} {
    %c0_i32 = arith.constant 0 : i32
    %0 = arith.cmpi eq, %arg1, %c0_i32 : i32
    %1 = arith.extui %0 : i1 to i32
    %c0_i32_0 = arith.constant 0 : i32
    %2 = arith.cmpi ne, %1, %c0_i32_0 : i32
    scf.if %2 {
      %cst_10 = arith.constant 0.000000e+00 : f32
      %12 = vector.broadcast %cst_10 : f32 to vector<16x16xf32>
      %c0_11 = arith.constant 0 : index
      %c0_12 = arith.constant 0 : index
      %13 = vector.load %arg6[%c0_11, %c0_12] : memref<16x16xf32, #tpu.memory_space<vmem>>, vector<16x16xf32>
      tpu.vector_store %arg6[%c0_11, %c0_12], %12 {strides = array<i32>} : memref<16x16xf32, #tpu.memory_space<vmem>>, vector<16x16xf32>,
    } else {
    }
    %c0 = arith.constant 0 : index
    %c0_1 = arith.constant 0 : index
    %3 = vector.load %arg6[%c0, %c0_1] : memref<16x16xf32, #tpu.memory_space<vmem>>, vector<16x16xf32>
    %c0_2 = arith.constant 0 : index
    %c0_3 = arith.constant 0 : index
    %4 = vector.load %arg2[%c0_2, %c0_3] : memref<16x16xbf16, #tpu.memory_space<vmem>>, vector<16x16xbf16>
    %c0_4 = arith.constant 0 : index
    %c0_5 = arith.constant 0 : index
    %5 = vector.load %arg3[%c0_4, %c0_5] : memref<16x16xbf16, #tpu.memory_space<vmem>>, vector<16x16xbf16>
    %cst = arith.constant dense<0.000000e+00> : vector<16x16xf32>
    %6 = tpu.matmul %4, %5, %cst {dimension_numbers = #tpu.dot_dimension_numbers<[1], [0], [0], [1], [0, 0, 1, 1], [], []>} : vector<16x16xbf16>, vector<16x16xbf16>, vector<16x16xf32> -> vector<16x16xf32>
    %7 = arith.addf %3, %6 : vector<16x16xf32>
    %c0_6 = arith.constant 0 : index
    %c0_7 = arith.constant 0 : index
    %8 = vector.load %arg6[%c0_6, %c0_7] : memref<16x16xf32, #tpu.memory_space<vmem>>, vector<16x16xf32>
    tpu.vector_store %arg6[%c0_6, %c0_7], %7 {strides = array<i32>} : memref<16x16xf32, #tpu.memory_space<vmem>>, vector<16x16xf32>,
    %c0_i32_8 = arith.constant 0 : i32
    %9 = arith.cmpi eq, %arg1, %c0_i32_8 : i32
    %10 = arith.extui %9 : i1 to i32
    %c0_i32_9 = arith.constant 0 : i32
    %11 = arith.cmpi ne, %10, %c0_i32_9 : i32
    scf.if %11 {
      %c0_10 = arith.constant 0 : index
      %c0_11 = arith.constant 0 : index
      %12 = vector.load %arg6[%c0_10, %c0_11] : memref<16x16xf32, #tpu.memory_space<vmem>>, vector<16x16xf32>
      %c0_12 = arith.constant 0 : index
      %c0_13 = arith.constant 0 : index
      %13 = vector.load %arg4[%c0_12, %c0_13] : memref<16x16xf32, #tpu.memory_space<vmem>>, vector<16x16xf32>
      %14 = arith.addf %12, %13 : vector<16x16xf32>
      %c0_14 = arith.constant 0 : index
      %c0_15 = arith.constant 0 : index
      %15 = vector.load %arg5[%c0_14, %c0_15] : memref<16x16xf32, #tpu.memory_space<vmem>>, vector<16x16xf32>
      tpu.vector_store %arg5[%c0_14, %c0_15], %14 {strides = array<i32>} : memref<16x16xf32, #tpu.memory_space<vmem>>, vector<16x16xf32>,
    } else {
    }
    return
  }
  func.func @transform_0(%arg0: i32, %arg1: i32) -> (i32, i32) {
    %c0_i32 = arith.constant 0 : i32
    return %arg0, %arg1 : i32, i32
  }
  func.func @transform_1(%arg0: i32, %arg1: i32) -> (i32, i32) {
    %c0_i32 = arith.constant 0 : i32
    %c0_i32_0 = arith.constant 0 : i32
    return %arg1, %c0_i32 : i32, i32
  }
  func.func @transform_2(%arg0: i32, %arg1: i32) -> (i32, i32) {
    %c0_i32 = arith.constant 0 : i32
    %c0_i32_0 = arith.constant 0 : i32
    return %arg0, %c0_i32 : i32, i32
  }
  func.func @transform_3(%arg0: i32, %arg1: i32) -> (i32, i32) {
    %c0_i32 = arith.constant 0 : i32
    %c0_i32_0 = arith.constant 0 : i32
    return %arg0, %c0_i32 : i32, i32
  }
}

</mosaic_0001>

<bundles_post_ra>
// kernel: leconv_gnn_edge_classifier.2
= control target key start
LH: loop header
LB: loop body
LE: loop exit
PB: predicated region body
PF: predicated region fallthrough
CT: control target
= control target key end

     0   :  { %vm19_vm0 = vcmask 130048   ;;  %v120_v0 = vmov 0.0   ;;  %vm121_vm1 = vmmov 0   ;;  %s167_s1 = inlined_call_operand.vmem [shape: bf16[16,16], index: 1, kind: input, shape index: {}]   ;;  %s168_s0 = inlined_call_operand.vmem [shape: bf16[16,16], index: 0, kind: input, shape index: {}]   ;;  %s169_s2 = inlined_call_operand.vmem [shape: f32[16,16], index: 2, kind: input, shape index: {}]   ;;  %s170_s3 = inlined_call_operand.vmem [shape: f32[16,16], index: 3, kind: output, shape index: {}]  }
   0x1   :  { %20 = vst.msk [vmem:[#allocation2] sm:$0xff] %vm19_vm0, %v120_v0  ;;  %21 = vst.msk [vmem:[#allocation2 + $0x8] sm:$0xff] %vm19_vm0, %v120_v0  ;;  %110 = vmatprep.subr.bf16.mxu0 %v120_v0  ;;  %v118_v1 = vld [vmem:[%s167_s1] sm:$0xff]   ;;  %112 = vmatprep.mubr.msk.bf16.mxu0 %vm121_vm1, %v120_v0  ;;  %v94_v14 = vld [vmem:[%s169_s2 + $0x8] sm:$0xff] }
   0x2   :  { %v119_v2 = vld [vmem:[%s168_s0] sm:$0xff]   ;;  %111 = vmatpush3.bf16.msra.mxu0 %v118_v1 }
   0x3   :  { %v93_v11 = vld [vmem:[%s169_s2] sm:$0xff] }
   0x5   :  { %113 = vmatmul.mubr.msk.bf16.vlgmr.msra.gmra.mxu0 %vm19_vm0, %v119_v2 }
   0x8   :  { %v22_v3 = vld [vmem:[#allocation2] sm:$0xff]  ;;  %v23_v7 = vld [vmem:[#allocation2 + $0x8] sm:$0xff] }
  0xc5   :  { %v77_v4 = vpop.f32.mrf.mxu0 }
  0xc6   :  { %v84_v5 = vadd.f32 %v77_v4, %v22_v3 }
  0xc7   :  { %v114_v6 = vpop.f32.mrf.mxu0 }
  0xc8   :  { %86 = vst.msk [vmem:[#allocation2] sm:$0xff] %vm19_vm0, %v84_v5 }
  0xc9   :  { %v80_v8 = vpop.f32.mrf.mxu0 }
  0xca   :  { %v85_v9 = vadd.f32 %v80_v8, %v23_v7 }
  0xcb   :  { %v115_v10 = vpop.f32.mrf.mxu0 }
  0xcc   :  { %87 = vst.msk [vmem:[#allocation2 + $0x8] sm:$0xff] %vm19_vm0, %v85_v9 }
  0xcf   :  { %v91_v12 = vld [vmem:[#allocation2] sm:$0xff] }
  0xd0   :  { %v95_v13 = vadd.f32 %v93_v11, %v91_v12 }
  0xd2   :  { %v97_v15 = vmax.f32 %v95_v13, 0.0 }
  0xd3   :  { %v92_v16 = vld [vmem:[#allocation2 + $0x8] sm:$0xff] }
  0xd4   :  { %99 = vst.msk [vmem:[%s170_s3] sm:$0xff] %vm19_vm0, %v97_v15  ;;  %v96_v17 = vadd.f32 %v94_v14, %v92_v16 }
  0xd6   :  { %v98_v18 = vmax.f32 %v96_v17, 0.0 }
  0xd8   :  { %100 = vst.msk [vmem:[%s170_s3 + $0x8] sm:$0xff] %vm19_vm0, %v98_v18 }

// kernel: leconv_gnn_edge_classifier.3
= control target key start
LH: loop header
LB: loop body
LE: loop exit
PB: predicated region body
PF: predicated region fallthrough
CT: control target
= control target key end

     0   :  { %vm19_vm0 = vcmask 130048   ;;  %v118_v0 = vmov 0.0   ;;  %vm119_vm1 = vmmov 0   ;;  %s165_s1 = inlined_call_operand.vmem [shape: bf16[16,16], index: 1, kind: input, shape index: {}]   ;;  %s166_s0 = inlined_call_operand.vmem [shape: bf16[16,16], index: 0, kind: input, shape index: {}]   ;;  %s167_s2 = inlined_call_operand.vmem [shape: f32[16,16], index: 2, kind: input, shape index: {}]   ;;  %s168_s3 = inlined_call_operand.vmem [shape: f32[16,16], index: 3, kind: output, shape index: {}]  }
   0x1   :  { %20 = vst.msk [vmem:[#allocation2] sm:$0xff] %vm19_vm0, %v118_v0  ;;  %21 = vst.msk [vmem:[#allocation2 + $0x8] sm:$0xff] %vm19_vm0, %v118_v0  ;;  %108 = vmatprep.subr.bf16.mxu0 %v118_v0  ;;  %v116_v1 = vld [vmem:[%s165_s1] sm:$0xff]   ;;  %110 = vmatprep.mubr.msk.bf16.mxu0 %vm119_vm1, %v118_v0  ;;  %v94_v14 = vld [vmem:[%s167_s2 + $0x8] sm:$0xff] }
   0x2   :  { %v117_v2 = vld [vmem:[%s166_s0] sm:$0xff]   ;;  %109 = vmatpush3.bf16.msra.mxu0 %v116_v1 }
   0x3   :  { %v93_v11 = vld [vmem:[%s167_s2] sm:$0xff] }
   0x5   :  { %111 = vmatmul.mubr.msk.bf16.vlgmr.msra.gmra.mxu0 %vm19_vm0, %v117_v2 }
   0x8   :  { %v22_v3 = vld [vmem:[#allocation2] sm:$0xff]  ;;  %v23_v7 = vld [vmem:[#allocation2 + $0x8] sm:$0xff] }
  0xc5   :  { %v77_v4 = vpop.f32.mrf.mxu0 }
  0xc6   :  { %v84_v5 = vadd.f32 %v77_v4, %v22_v3 }
  0xc7   :  { %v112_v6 = vpop.f32.mrf.mxu0 }
  0xc8   :  { %86 = vst.msk [vmem:[#allocation2] sm:$0xff] %vm19_vm0, %v84_v5 }
  0xc9   :  { %v80_v8 = vpop.f32.mrf.mxu0 }
  0xca   :  { %v85_v9 = vadd.f32 %v80_v8, %v23_v7 }
  0xcb   :  { %v113_v10 = vpop.f32.mrf.mxu0 }
  0xcc   :  { %87 = vst.msk [vmem:[#allocation2 + $0x8] sm:$0xff] %vm19_vm0, %v85_v9 }
  0xcf   :  { %v91_v12 = vld [vmem:[#allocation2] sm:$0xff] }
  0xd0   :  { %v95_v13 = vadd.f32 %v93_v11, %v91_v12 }
  0xd2   :  { %97 = vst.msk [vmem:[%s168_s3] sm:$0xff] %vm19_vm0, %v95_v13 }
  0xd3   :  { %v92_v15 = vld [vmem:[#allocation2 + $0x8] sm:$0xff] }
  0xd4   :  { %v96_v16 = vadd.f32 %v94_v14, %v92_v15 }
  0xd6   :  { %98 = vst.msk [vmem:[%s168_s3 + $0x8] sm:$0xff] %vm19_vm0, %v96_v16 }

</bundles_post_ra>
